<compile_context>
chip_gen: v7x
topology: tpu7x:2x2x1
jax: 0.10.0
libtpu: 0.0.40
codegen_flags: <defaults>
</compile_context>

<pallas_src>
import math

import jax
import jax.numpy as jnp
from jax import lax
from jax.experimental import pallas as pl
from jax.experimental.pallas import tpu as pltpu

EPS = 1e-5
LEAKY_SLOPE = 0.01          # InPlaceABN default activation parameter
LANE = 128


# ---------------------------------------------------------------------------
# Small helpers
# ---------------------------------------------------------------------------
def _round_up(x, m):
    return (x + m - 1) // m * m


def _pad_last(a, c):
    if a.shape[-1] == c:
        return a
    cfg = [(0, 0)] * (a.ndim - 1) + [(0, c - a.shape[-1])]
    return jnp.pad(a, cfg)


_SINGLE_BUFFER_OK = None


def _single_buffer_supported():
    """Probe whether this Pallas build accepts pl.Buffered(buffer_count=1)."""
    global _SINGLE_BUFFER_OK
    if _SINGLE_BUFFER_OK is None:
        def _copy(x_ref, o_ref):
            o_ref[...] = x_ref[...]
        try:
            x = jnp.zeros((8, LANE), jnp.float32)
            y = pl.pallas_call(
                _copy,
                out_shape=jax.ShapeDtypeStruct((8, LANE), jnp.float32),
                grid=(1,),
                in_specs=[pl.BlockSpec(
                    (8, LANE), lambda i: (0, 0),
                    pipeline_mode=pl.Buffered(buffer_count=1))],
                out_specs=pl.BlockSpec((8, LANE), lambda i: (0, 0)),
            )(x)
            jax.block_until_ready(y)
            _SINGLE_BUFFER_OK = True
        except Exception:            # capability probe only
            _SINGLE_BUFFER_OK = False
    return _SINGLE_BUFFER_OK


def _resident_spec(block_shape, index_map):
    """BlockSpec for a grid-invariant operand: single-buffer it to save VMEM
    (falls back to the default double-buffering if unsupported)."""
    if _single_buffer_supported():
        return pl.BlockSpec(block_shape, index_map,
                            pipeline_mode=pl.Buffered(buffer_count=1))
    return pl.BlockSpec(block_shape, index_map)


def _compiler_params(working_set_bytes):
    # Derive the scoped-VMEM request from the real per-step working set,
    # clamped: >=32 MiB lifts v5e's 16 MiB default, <=56 MiB stays inside
    # v7x's 64 MiB physical VMEM.
    vmem = int(max(32 * 1024 * 1024, min(working_set_bytes, 56 * 1024 * 1024)))
    return pltpu.CompilerParams(
        dimension_semantics=("parallel", "parallel"),
        vmem_limit_bytes=vmem)


def _fused_working_set(hp, wp, ci, m, tn, sc_ch, out_bytes):
    return (2 * hp * wp * ci * 2        # double-buffered padded input block
            + 9 * ci * tn * 2           # resident (single-buffered) weight
            + 2 * m * 9 * ci * 2        # in-kernel tap slab + relayout slack
            + 3 * m * tn * 4            # f32 accumulator / epilogue temps
            + 2 * m * tn * out_bytes    # double-buffered output block
            + 2 * m * sc_ch * 2)        # shortcut block (0 if none)


# ---------------------------------------------------------------------------
# Pallas kernels
# ---------------------------------------------------------------------------
def _make_conv3x3_s1_kernel(Ho, Wo, mode):
    """Fused stride-1 3x3 conv over one spatially-padded NHWC image block.

    Input block : (1, Ho+2, Wo+2, Ci) bf16 (halo already inside the block).
    Weight      : (9*Ci, TN) bf16, BN scale pre-folded.
    The 9 taps are shifted VMEM slices concatenated into one deep-K
    (Ho*Wo, 9*Ci) slab -> a single MXU matmul per (image, Cout-tile).
    """
    M = Ho * Wo

    def _flatten_rows(v, want_dtype):
        # (Ho, Wo, C) -> (M, C).  Bounce through f32 when bf16 sublane packing
        # (16 rows / tile) would make the collapse non-tile-aligned.
        if v.dtype == jnp.bfloat16 and Wo % 16 != 0:
            v = v.astype(jnp.float32)
        v = v.reshape(M, v.shape[-1])
        return v.astype(want_dtype)

    def conv(x_ref, w_ref):
        taps = [x_ref[0, dy:dy + Ho, dx:dx + Wo, :]
                for dy in range(3) for dx in range(3)]
        p = _flatten_rows(jnp.concatenate(taps, axis=-1), w_ref.dtype)
        return jnp.dot(p, w_ref[...], preferred_element_type=jnp.float32)

    if mode == "bn_leaky":                  # conv1 + bn1 + leaky_relu(0.01)
        def kernel(x_ref, w_ref, b_ref, o_ref):
            y = conv(x_ref, w_ref) + b_ref[...]
            y = jnp.where(y >= 0, y, LEAKY_SLOPE * y)
            o_ref[0] = y.reshape(Ho, Wo, -1).astype(o_ref.dtype)
        return kernel

    if mode == "bn_add_relu_id":            # conv2 + bn2 + identity + relu
        def kernel(x_ref, w_ref, b_ref, sc_ref, o_ref):
            res = conv(x_ref, w_ref) + b_ref[...]
            sc = _flatten_rows(sc_ref[0], jnp.float32)
            y = jnp.maximum(res + sc, 0.0)
            o_ref[0] = y.reshape(Ho, Wo, -1).astype(o_ref.dtype)
        return kernel

    if mode == "bn_add_relu_ds":            # conv2 + bn2 + (1x1 conv + bn) + relu
        def kernel(x_ref, w_ref, b_ref, scx_ref, wd_ref, bd_ref, o_ref):
            res = conv(x_ref, w_ref) + b_ref[...]
            scm = _flatten_rows(scx_ref[0], wd_ref.dtype)
            sc = jnp.dot(scm, wd_ref[...],
                         preferred_element_type=jnp.float32) + bd_ref[...]
            y = jnp.maximum(res + sc, 0.0)
            o_ref[0] = y.reshape(Ho, Wo, -1).astype(o_ref.dtype)
        return kernel

    raise ValueError(mode)


def _gemm_bn_leaky_kernel(p_ref, w_ref, b_ref, o_ref):
    """Fallback for the stride>1 conv1: one GEMM over a pre-built im2col slab."""
    y = jnp.dot(p_ref[0], w_ref[...], preferred_element_type=jnp.float32)
    y = y + b_ref[...]
    o_ref[0] = jnp.where(y >= 0, y, LEAKY_SLOPE * y).astype(o_ref.dtype)


# ---------------------------------------------------------------------------
# Parameter init / prep (plain JAX)
# ---------------------------------------------------------------------------
def _bn_params(key, c):
    k1, k2, k3, k4 = jax.random.split(key, 4)
    gamma = jax.random.uniform(k1, (c,), jnp.float32, 0.5, 1.5)
    beta = jax.random.uniform(k2, (c,), jnp.float32, -0.5, 0.5)
    mean = jax.random.uniform(k3, (c,), jnp.float32, -0.5, 0.5)
    var = jax.random.uniform(k4, (c,), jnp.float32, 0.5, 1.5)
    return gamma, beta, mean, var


def _bn_scale_bias(bn):
    gamma, beta, mean, var = bn
    scale = gamma / jnp.sqrt(var + EPS)
    bias = beta - mean * scale
    return scale, bias


def init_basic_block_params(key, in_channels, channels, stride):
    ks = jax.random.split(key, 6)

    def conv_w(k, cout, cin, kh, kw):
        bound = 1.0 / (cin * kh * kw) ** 0.5
        return jax.random.uniform(k, (cout, cin, kh, kw), jnp.float32,
                                  -bound, bound)

    params = {
        "w1": conv_w(ks[0], channels, in_channels, 3, 3),   # PyTorch OIHW
        "w2": conv_w(ks[1], channels, channels, 3, 3),
        "bn1": _bn_params(ks[2], channels),
        "bn2": _bn_params(ks[3], channels),
    }
    if in_channels != channels or stride != 1:
        params["wd"] = conv_w(ks[4], channels, in_channels, 1, 1)
        params["bnd"] = _bn_params(ks[5], channels)
    return params


def _prep_w3x3(w_oihw, bn, cip, cop):
    """OIHW 3x3 weight + BN -> scale-folded, zero-padded (9*cip, cop) bf16
    matmul weight and a (1, cop) f32 bias."""
    cout, cin = w_oihw.shape[0], w_oihw.shape[1]
    scale, bias = _bn_scale_bias(bn)
    w = jnp.transpose(w_oihw, (2, 3, 1, 0)) * scale              # (3,3,Ci,Co)
    w = jnp.pad(w, ((0, 0), (0, 0), (0, cip - cin), (0, cop - cout)))
    w = w.reshape(9 * cip, cop).astype(jnp.bfloat16)
    b = jnp.pad(bias, (0, cop - cout)).reshape(1, cop).astype(jnp.float32)
    return w, b


def _prep_w1x1(w_oihw, bn, cip, cop):
    cout, cin = w_oihw.shape[0], w_oihw.shape[1]
    scale, bias = _bn_scale_bias(bn)
    w = w_oihw.reshape(cout, cin).T * scale                      # (Ci, Co)
    w = jnp.pad(w, ((0, cip - cin), (0, cop - cout))).astype(jnp.bfloat16)
    b = jnp.pad(bias, (0, cop - cout)).reshape(1, cop).astype(jnp.float32)
    return w, b


# ---------------------------------------------------------------------------
# Forward pass
# ---------------------------------------------------------------------------
def basic_block_forward_nhwc(x_nhwc, params, stride, cout_tile=256):
    """BasicBlock forward, NHWC in / NHWC(bf16) out, lane-padded channels."""
    N, H, W, Cin = x_nhwc.shape
    Cout = params["w1"].shape[0]
    has_down = "wd" in params

    Cip = _round_up(Cin, LANE)               # lane-dense input channels
    Cop = _round_up(Cout, LANE)              # lane-dense output channels
    TN = math.gcd(Cop, _round_up(cout_tile, LANE))   # Cout tile (divides Cop)
    n_j = Cop // TN

    Ho = (H - 1) // stride + 1
    Wo = (W - 1) // stride + 1
    M = Ho * Wo
    Hp, Wp = Ho + 2, Wo + 2

    w1, b1 = _prep_w3x3(params["w1"], params["bn1"], Cip, Cop)
    w2, b2 = _prep_w3x3(params["w2"], params["bn2"], Cop, Cop)

    # Single cheap pass over x: channel-pad to a lane multiple + bf16 cast.
    xp = _pad_last(x_nhwc.astype(jnp.float32), Cip).astype(jnp.bfloat16)

    # ---------------- conv1 + bn1 + leaky_relu ------------------------------
    if stride == 1:
        x1 = jnp.pad(xp, ((0, 0), (1, 1), (1, 1), (0, 0)))      # halo pad
        ws = _fused_working_set(Hp, Wp, Cip, M, TN, 0, 2)
        cost = pl.CostEstimate(
            flops=2 * N * M * 9 * Cip * Cop, transcendentals=0,
            bytes_accessed=x1.size * 2 + w1.size * 2 + b1.size * 4
            + N * M * Cop * 2)
        h1 = pl.pallas_call(
            _make_conv3x3_s1_kernel(Ho, Wo, "bn_leaky"),
            out_shape=jax.ShapeDtypeStruct((N, Ho, Wo, Cop), jnp.bfloat16),
            grid=(n_j, N),
            in_specs=[
                pl.BlockSpec((1, Hp, Wp, Cip), lambda j, n: (n, 0, 0, 0)),
                _resident_spec((9 * Cip, TN), lambda j, n: (0, j)),
                _resident_spec((1, TN), lambda j, n: (0, j)),
            ],
            out_specs=pl.BlockSpec((1, Ho, Wo, TN), lambda j, n: (n, 0, 0, j)),
            compiler_params=_compiler_params(ws),
            cost_estimate=cost,
        )(x1, w1, b1)
    else:
        # TODO(synk): stride>1 conv1 still builds an XLA im2col slab (9x at
        # output resolution); in-kernel strided tap gathers would remove it.
        xpad = jnp.pad(xp, ((0, 0), (1, 1), (1, 1), (0, 0)))
        slabs = []
        for dy in range(3):
            for dx in range(3):
                s = lax.slice(
                    xpad, (0, dy, dx, 0),
                    (N, dy + (Ho - 1) * stride + 1,
                     dx + (Wo - 1) * stride + 1, Cip),
                    (1, stride, stride, 1))
                slabs.append(s.reshape(N, M, Cip))
        p1 = jnp.concatenate(slabs, axis=-1)                    # (N, M, 9*Cip)
        ws = (2 * M * 9 * Cip * 2 + 9 * Cip * TN * 2
              + 3 * M * TN * 4 + 2 * M * TN * 2)
        cost = pl.CostEstimate(
            flops=2 * N * M * 9 * Cip * Cop, transcendentals=0,
            bytes_accessed=p1.size * 2 + w1.size * 2 + b1.size * 4
            + N * M * Cop * 2)
        h1 = pl.pallas_call(
            _gemm_bn_leaky_kernel,
            out_shape=jax.ShapeDtypeStruct((N, M, Cop), jnp.bfloat16),
            grid=(n_j, N),
            in_specs=[
                pl.BlockSpec((1, M, 9 * Cip), lambda j, n: (n, 0, 0)),
                _resident_spec((9 * Cip, TN), lambda j, n: (0, j)),
                _resident_spec((1, TN), lambda j, n: (0, j)),
            ],
            out_specs=pl.BlockSpec((1, M, TN), lambda j, n: (n, 0, j)),
            compiler_params=_compiler_params(ws),
            cost_estimate=cost,
        )(p1, w1, b1).reshape(N, Ho, Wo, Cop)

    # ---------------- conv2 + bn2 + shortcut + relu -------------------------
    # TODO(synk): this halo pad is one extra XLA pass over h1; it could be
    # folded into conv1's output stores (padded out_shape + border writes).
    h1p = jnp.pad(h1, ((0, 0), (1, 1), (1, 1), (0, 0)))

    if has_down:
        wd, bd = _prep_w1x1(params["wd"], params["bnd"], Cip, Cop)
        scx = xp[:, ::stride, ::stride, :]                      # (N,Ho,Wo,Cip)
        ws = _fused_working_set(Hp, Wp, Cop, M, TN, Cip, 2) + Cip * TN * 2
        cost = pl.CostEstimate(
            flops=2 * N * M * (9 * Cop + Cip) * Cop, transcendentals=0,
            bytes_accessed=h1p.size * 2 + scx.size * 2 + w2.size * 2
            + wd.size * 2 + N * M * Cop * 2)
        out = pl.pallas_call(
            _make_conv3x3_s1_kernel(Ho, Wo, "bn_add_relu_ds"),
            out_shape=jax.ShapeDtypeStruct((N, Ho, Wo, Cop), jnp.bfloat16),
            grid=(n_j, N),
            in_specs=[
                pl.BlockSpec((1, Hp, Wp, Cop), lambda j, n: (n, 0, 0, 0)),
                _resident_spec((9 * Cop, TN), lambda j, n: (0, j)),
                _resident_spec((1, TN), lambda j, n: (0, j)),
                pl.BlockSpec((1, Ho, Wo, Cip), lambda j, n: (n, 0, 0, 0)),
                _resident_spec((Cip, TN), lambda j, n: (0, j)),
                _resident_spec((1, TN), lambda j, n: (0, j)),
            ],
            out_specs=pl.BlockSpec((1, Ho, Wo, TN), lambda j, n: (n, 0, 0, j)),
            compiler_params=_compiler_params(ws),
            cost_estimate=cost,
        )(h1p, w2, b2, scx, wd, bd)
    else:
        # Identity shortcut: Cin == Cout and stride == 1 -> xp already has the
        # lane-padded output channel count and sits at output resolution.
        ws = _fused_working_set(Hp, Wp, Cop, M, TN, TN, 2)
        cost = pl.CostEstimate(
            flops=2 * N * M * 9 * Cop * Cop, transcendentals=0,
            bytes_accessed=h1p.size * 2 + xp.size * 2 + w2.size * 2
            + N * M * Cop * 2)
        out = pl.pallas_call(
            _make_conv3x3_s1_kernel(Ho, Wo, "bn_add_relu_id"),
            out_shape=jax.ShapeDtypeStruct((N, Ho, Wo, Cop), jnp.bfloat16),
            grid=(n_j, N),
            in_specs=[
                pl.BlockSpec((1, Hp, Wp, Cop), lambda j, n: (n, 0, 0, 0)),
                _resident_spec((9 * Cop, TN), lambda j, n: (0, j)),
                _resident_spec((1, TN), lambda j, n: (0, j)),
                pl.BlockSpec((1, Ho, Wo, TN), lambda j, n: (n, 0, 0, j)),
            ],
            out_specs=pl.BlockSpec((1, Ho, Wo, TN), lambda j, n: (n, 0, 0, j)),
            compiler_params=_compiler_params(ws),
            cost_estimate=cost,
        )(h1p, w2, b2, xp)

    return out[..., :Cout]


def basic_block_forward(x_nchw, params, stride, cout_tile=256):
    """NCHW wrapper kept only to mirror the PyTorch interface; chained blocks
    should call basic_block_forward_nhwc directly and stay NHWC / bf16."""
    x = jnp.transpose(x_nchw, (0, 2, 3, 1))
    out = basic_block_forward_nhwc(x, params, stride, cout_tile)
    return jnp.transpose(out, (0, 3, 1, 2)).astype(x_nchw.dtype)


# ---------------------------------------------------------------------------
# Pure-JAX reference (lax.conv) for correctness checking
# ---------------------------------------------------------------------------
def ref_forward(x_nchw, params, stride):
    dn = ("NHWC", "HWIO", "NHWC")
    x = jnp.transpose(x_nchw, (0, 2, 3, 1)).astype(jnp.float32)
    w1 = jnp.transpose(params["w1"], (2, 3, 1, 0))
    w2 = jnp.transpose(params["w2"], (2, 3, 1, 0))
    s1, b1 = _bn_scale_bias(params["bn1"])
    s2, b2 = _bn_scale_bias(params["bn2"])

    h = lax.conv_general_dilated(x, w1, (stride, stride), ((1, 1), (1, 1)),
                                 dimension_numbers=dn)
    h = h * s1 + b1
    h = jnp.where(h >= 0, h, LEAKY_SLOPE * h)
    r = lax.conv_general_dilated(h, w2, (1, 1), ((1, 1), (1, 1)),
                                 dimension_numbers=dn)
    r = r * s2 + b2
    if "wd" in params:
        wd = jnp.transpose(params["wd"], (2, 3, 1, 0))
        sd, bd = _bn_scale_bias(params["bnd"])
        sc = lax.conv_general_dilated(x, wd, (stride, stride),
                                      ((0, 0), (0, 0)), dimension_numbers=dn)
        sc = sc * sd + bd
    else:
        sc = x
    out = jnp.maximum(r + sc, 0.0)
    return jnp.transpose(out, (0, 3, 1, 2))


if __name__ == "__main__":
    key = jax.random.PRNGKey(0)
    kx1, kx2, kp1, kp2 = jax.random.split(key, 4)

    # Case 1: downsample branch (in_channels != channels, stride=2).
    x1 = jax.random.normal(kx1, (2, 4, 16, 16), jnp.float32)
    p1 = init_basic_block_params(kp1, in_channels=4, channels=8, stride=2)
    y1 = basic_block_forward(x1, p1, stride=2)
    jax.block_until_ready(y1)
    r1 = ref_forward(x1, p1, stride=2)
    assert y1.shape == (2, 8, 8, 8), y1.shape
    assert jnp.allclose(y1, r1, rtol=5e-2, atol=5e-2), float(
        jnp.max(jnp.abs(y1 - r1)))

    # Case 2: identity shortcut (in_channels == channels, stride=1).
    x2 = jax.random.normal(kx2, (2, 8, 16, 16), jnp.float32)
    p2 = init_basic_block_params(kp2, in_channels=8, channels=8, stride=1)
    y2 = basic_block_forward(x2, p2, stride=1)
    jax.block_until_ready(y2)
    r2 = ref_forward(x2, p2, stride=1)
    assert y2.shape == (2, 8, 16, 16), y2.shape
    assert jnp.allclose(y2, r2, rtol=5e-2, atol=5e-2), float(
        jnp.max(jnp.abs(y2 - r2)))

    print("KERNEL_OK")
</pallas_src>

<mosaic_0001>
module attributes {stable_mosaic.version = 11 : i64} {
  func.func @_copy(%arg0: i32, %arg1: memref<8x128xf32, #tpu.memory_space<vmem>>, %arg2: memref<8x128xf32, #tpu.memory_space<vmem>>) attributes {dimension_semantics = [#tpu.dimension_semantics<arbitrary>], iteration_bounds = array<i64: 1>, scalar_prefetch = 0 : i64, scratch_operands = 0 : i64, tpu.core_type = #tpu.core_type<tc>, window_params = [{pipeline_mode = #tpu.pipeline_mode<synchronous>, transform_indices = @transform_0, window_bounds = array<i64: 8, 128>}, {pipeline_mode = #tpu.pipeline_mode<synchronous>, transform_indices = @transform_1, window_bounds = array<i64: 8, 128>}]} {
    %c0 = arith.constant 0 : index
    %c0_0 = arith.constant 0 : index
    %0 = vector.load %arg1[%c0, %c0_0] : memref<8x128xf32, #tpu.memory_space<vmem>>, vector<8x128xf32>
    %c0_1 = arith.constant 0 : index
    %c0_2 = arith.constant 0 : index
    %1 = vector.load %arg2[%c0_1, %c0_2] : memref<8x128xf32, #tpu.memory_space<vmem>>, vector<8x128xf32>
    tpu.vector_store %arg2[%c0_1, %c0_2], %0 {strides = array<i32>} : memref<8x128xf32, #tpu.memory_space<vmem>>, vector<8x128xf32>,
    return
  }
  func.func @transform_0(%arg0: i32) -> (i32, i32) {
    %c0_i32 = arith.constant 0 : i32
    %c0_i32_0 = arith.constant 0 : i32
    %c0_i32_1 = arith.constant 0 : i32
    return %c0_i32, %c0_i32_0 : i32, i32
  }
  func.func @transform_1(%arg0: i32) -> (i32, i32) {
    %c0_i32 = arith.constant 0 : i32
    %c0_i32_0 = arith.constant 0 : i32
    %c0_i32_1 = arith.constant 0 : i32
    return %c0_i32, %c0_i32_0 : i32, i32
  }
}

module attributes {stable_mosaic.version = 11 : i64} {
  func.func @_gemm_bn_leaky_kernel(%arg0: i32, %arg1: i32, %arg2: memref<1x64x1152xbf16, #tpu.memory_space<vmem>>, %arg3: memref<1152x128xbf16, #tpu.memory_space<vmem>>, %arg4: memref<1x128xf32, #tpu.memory_space<vmem>>, %arg5: memref<1x64x128xbf16, #tpu.memory_space<vmem>>) attributes {dimension_semantics = [#tpu.dimension_semantics<parallel>, #tpu.dimension_semantics<parallel>], iteration_bounds = array<i64: 1, 2>, scalar_prefetch = 0 : i64, scratch_operands = 0 : i64, tpu.core_type = #tpu.core_type<tc>, window_params = [{transform_indices = @transform_0, window_bounds = array<i64: 1, 64, 1152>}, {transform_indices = @transform_1, window_bounds = array<i64: 1152, 128>}, {transform_indices = @transform_2, window_bounds = array<i64: 1, 128>}, {transform_indices = @transform_3, window_bounds = array<i64: 1, 64, 128>}]} {
    %c0 = arith.constant 0 : index
    %c0_0 = arith.constant 0 : index
    %c0_1 = arith.constant 0 : index
    %0 = vector.load %arg2[%c0, %c0_0, %c0_1] : memref<1x64x1152xbf16, #tpu.memory_space<vmem>>, vector<1x64x1152xbf16>
    %1 = vector.shape_cast %0 : vector<1x64x1152xbf16> to vector<64x1152xbf16>
    %c0_2 = arith.constant 0 : index
    %c0_3 = arith.constant 0 : index
    %2 = vector.load %arg3[%c0_2, %c0_3] : memref<1152x128xbf16, #tpu.memory_space<vmem>>, vector<1152x128xbf16>
    %cst = arith.constant dense<0.000000e+00> : vector<64x128xf32>
    %3 = tpu.matmul %1, %2, %cst {dimension_numbers = #tpu.dot_dimension_numbers<[1], [0], [0], [1], [0, 0, 1, 1], [], []>} : vector<64x1152xbf16>, vector<1152x128xbf16>, vector<64x128xf32> -> vector<64x128xf32>
    %c0_4 = arith.constant 0 : index
    %c0_5 = arith.constant 0 : index
    %4 = vector.load %arg4[%c0_4, %c0_5] : memref<1x128xf32, #tpu.memory_space<vmem>>, vector<1x128xf32>
    %5 = vector.broadcast %4 : vector<1x128xf32> to vector<64x128xf32>
    %6 = arith.addf %3, %5 : vector<64x128xf32>
    %cst_6 = arith.constant 0.000000e+00 : f32
    %7 = vector.broadcast %cst_6 : f32 to vector<64x128xf32>
    %8 = arith.cmpf oge, %6, %7 : vector<64x128xf32>
    %cst_7 = arith.constant 0.00999999977 : f32
    %9 = vector.broadcast %cst_7 : f32 to vector<64x128xf32>
    %10 = arith.mulf %9, %6 : vector<64x128xf32>
    %11 = arith.select %8, %6, %10 : vector<64x128xi1>, vector<64x128xf32>
    %12 = arith.truncf %11 : vector<64x128xf32> to vector<64x128xbf16>
    %c0_8 = arith.constant 0 : index
    %c0_9 = arith.constant 0 : index
    %c0_10 = arith.constant 0 : index
    %13 = vector.load %arg5[%c0_8, %c0_9, %c0_10] : memref<1x64x128xbf16, #tpu.memory_space<vmem>>, vector<1x64x128xbf16>
    %14 = vector.shape_cast %13 : vector<1x64x128xbf16> to vector<64x128xbf16>
    %15 = vector.shape_cast %12 : vector<64x128xbf16> to vector<1x64x128xbf16>
    tpu.vector_store %arg5[%c0_8, %c0_9, %c0_10], %15 {strides = array<i32>} : memref<1x64x128xbf16, #tpu.memory_space<vmem>>, vector<1x64x128xbf16>,
    return
  }
  func.func @transform_0(%arg0: i32, %arg1: i32) -> (i32, i32, i32) {
    %c0_i32 = arith.constant 0 : i32
    %c0_i32_0 = arith.constant 0 : i32
    %c0_i32_1 = arith.constant 0 : i32
    return %arg1, %c0_i32, %c0_i32_0 : i32, i32, i32
  }
  func.func @transform_1(%arg0: i32, %arg1: i32) -> (i32, i32) {
    %c0_i32 = arith.constant 0 : i32
    %c0_i32_0 = arith.constant 0 : i32
    return %c0_i32, %arg0 : i32, i32
  }
  func.func @transform_2(%arg0: i32, %arg1: i32) -> (i32, i32) {
    %c0_i32 = arith.constant 0 : i32
    %c0_i32_0 = arith.constant 0 : i32
    return %c0_i32, %arg0 : i32, i32
  }
  func.func @transform_3(%arg0: i32, %arg1: i32) -> (i32, i32, i32) {
    %c0_i32 = arith.constant 0 : i32
    %c0_i32_0 = arith.constant 0 : i32
    return %arg1, %c0_i32, %arg0 : i32, i32, i32
  }
}

</mosaic_0001>

<bundles_post_ra>
// kernel: tpu_custom_call.1
= control target key start
LH: loop header
LB: loop body
LE: loop exit
PB: predicated region body
PF: predicated region fallthrough
CT: control target
= control target key end

     0   :  { %6 = vsyncpa [#allocation3], 0  ;;  %s124_s0 = inlined_call_operand.hbm [shape: f32[8,128], index: 0, kind: input, shape index: {}]   ;;  %s125_s1 = inlined_call_operand.hbm [shape: f32[8,128], index: 1, kind: output, shape index: {}]  }
   0x1   :  { %7 = vsyncpa [#allocation4], 0  ;;  %s88_s6 = smov [#allocation2]   ;;  %s40_s10 = scalar_lea.hbm %s124_s0, 128 }
   0x2   :  { %s14_s7 = sshll.u32 %s88_s6, 4  ;;  %p41_p0 = scmp.ne.s32.totalorder %s124_s0, %s40_s10  ;;  %s15_s7 = int_to_ptr.vmem [resolvable:$true] %s14_s7 }
   0x3   :  { %p44_p1 = scmp.lt.u32.totalorder %s40_s10, %s124_s0 }
   0x5   :  { %p46_p2 = pnand %p44_p1, %p41_p0 }
   0x7   :  { %49 = shalt.err (!%p46_p2)
}
   0x8   :  { %s50_s15 = scalar_lea.vmem %s15_s7, 128  ;;  %p55_p4 = scmp.lt.s32.totalorder %s15_s7, %s15_s7 }
   0x9   :  { %p51_p3 = scmp.ne.s32.totalorder %s15_s7, %s50_s15  ;;  %p56_p5 = scmp.lt.s32.totalorder %s50_s15, %s50_s15 }
   0xb   :  { %p57_p6 = por %p56_p5, %p55_p4 }
   0xd   :  { %p58_p7 = pnand %p57_p6, %p51_p3 }
   0xf   :  { %61 = shalt.err (!%p58_p7)
}
  0x10   :  { %17 = dma.hbm_to_vmem [thread:$0]  %s124_s0, 128, %s15_s7, [#allocation3]  }
  0x11   :  { %84 = dma.done.wait [#allocation3], 128  }
  0x12   :  { %85 = vsyncadd [#allocation3], 4294967168  ;;  %s89_s18 = smov [#allocation5]   ;;  %v21_v0 = vld [vmem:[#allocation2] sm:$0xff] }
  0x13   :  { %s29_s19 = sshll.u32 %s89_s18, 4  ;;  %22 = vst [vmem:[#allocation5] sm:$0xff] %v21_v0  ;;  %s30_s19 = int_to_ptr.vmem [resolvable:$true] %s29_s19 }
  0x14   :  { %s62_s20 = scalar_lea.vmem %s30_s19, 128  ;;  %p67_p9 = scmp.lt.s32.totalorder %s30_s19, %s30_s19 }
  0x15   :  { %p63_p8 = scmp.ne.s32.totalorder %s30_s19, %s62_s20  ;;  %p68_p10 = scmp.lt.s32.totalorder %s62_s20, %s62_s20 }
  0x17   :  { %p69_p11 = por %p68_p10, %p67_p9 }
  0x19   :  { %p70_p12 = pnand %p69_p11, %p63_p8 }
  0x1b   :  { %73 = shalt.err (!%p70_p12)
}
  0x1c   :  { %s74_s23 = scalar_lea.hbm %s125_s1, 128 }
  0x1d   :  { %p75_p13 = scmp.ne.s32.totalorder %s125_s1, %s74_s23  ;;  %p78_p0 = scmp.lt.u32.totalorder %s74_s23, %s125_s1 }
  0x1f   :  { %p80_p1 = pnand %p78_p0, %p75_p13 }
  0x21   :  { %83 = shalt.err (!%p80_p1)
}
  0x22   :  { %32 = dma.vmem_to_hbm [thread:$0]  %s30_s19, 128, %s125_s1, [#allocation4]  }
  0x23   :  { %86 = dma.done.wait [#allocation4], 128  }
  0x24   :  { %87 = vsyncadd [#allocation4], 4294967168 }
  0x25   :  { %36 = vsyncpa [#allocation3], 1 }
  0x26   :  { %37 = vsyncpa [#allocation4], 1 }

// kernel: tpu_custom_call.1
= control target key start
LH: loop header
LB: loop body
LE: loop exit
PB: predicated region body
PF: predicated region fallthrough
CT: control target
= control target key end

     0   :  { %8 = vsyncpa [#allocation3], 0  ;;  %s2576_s0 = inlined_call_operand.hbm [shape: bf16[2,64,1152], index: 0, kind: input, shape index: {}]   ;;  %s2577_s1 = inlined_call_operand.hbm [shape: bf16[1152,128], index: 1, kind: input, shape index: {}]   ;;  %s2578_s2 = inlined_call_operand.vmem [shape: f32[1,128], index: 2, kind: input, shape index: {}]   ;;  %s2579_s3 = inlined_call_operand.hbm [shape: bf16[2,64,128], index: 3, kind: output, shape index: {}]  }
   0x1   :  { %10 = vsyncpa [#allocation3 + $0x1], 0 }
   0x2   :  { %11 = vsyncpa [#allocation6], 0 }
   0x3   :  { %12 = vsyncpa [#allocation4], 0 }
   0x4   :  { %14 = vsyncpa [#allocation4 + $0x1], 0  ;;  %s2315_s12 = smov 0   ;;  %s2317_s13 = smov 0  }
   0x5   :  { %s2319_s14 = smov 0   ;;  %s2321_s15 = smov 0  }
   0x6   :  { %s2323_s16 = smov 0   ;;  %s2325_s17 = smov 0  }
   0x7 LB: > { %s1558_s18 = sadd.s32 4294967295, %s2284_s17   ;;  %s1559_s19 = sadd.s32 4294967294, %s2284_s17   ;;  %s2284_s17 = sphi %s2325_s17, %s20_s17   ;;  %s2280_s16 = sphi %s2323_s16, %s2602_s16   ;;  %s2276_s15 = sphi %s2321_s15, %s2601_s15   ;;  %s2272_s14 = sphi %s2319_s14, %s2600_s14   ;;  %s2268_s13 = sphi %s2317_s13, %s2599_s13   ;;  %s2264_s12 = sphi %s2315_s12, %s2598_s12  }
   0x8   : > { %p52_p0 = scmp.ne.s32.totalorder %s2268_s13, %s2264_s12  ;;  %p2349_p1 = scmp.eq.s32.totalorder %s1558_s18, 0 }
   0x9   : > { %p2353_p2 = scmp.eq.s32.totalorder %s1558_s18, 1  ;;  %p136_p3 = scmp.eq.s32.totalorder %s1559_s19, 1 }
   0xa   : > { %s2584_s20 = scalar_select %p2349_p1, 1, 0 }
   0xb   : > { %s2585_s21 = scalar_select %p2353_p2, 1, 0 }
   0xc   : > { %p2359_p4 = por %p2349_p1, %p52_p0  ;;  %p1560_p5 = scmp.ge.s32.totalorder %s2284_s17, 1 }
   0xd   : > { %p2364_p6 = por %p136_p3, %p52_p0  ;;  %p143_p7 = scmp.lt.s32.totalorder %s2284_s17, 3 }
   0xe   : > { %s2586_s22 = scalar_select %p2359_p4, 1, 0 }
   0xf   : > { %s2587_s23 = scalar_select %p2364_p6, 1, 0 }
  0x10   : > { %p2369_p8 = pnand %p1560_p5, %p143_p7  ;;  %s2286_s25 = smov [#allocation5]  }
  0x11   : > { %s157_s26 = sshll.u32 %s2286_s25, 4  ;;  %s29_s28 = sadd.s32 1, %s2280_s16  ;;  %s158_s26 = int_to_ptr.vmem [resolvable:$true] %s157_s26 }
  0x12   : > { %s2588_s24 = scalar_select %p2369_p8, 1, 0 }
  0x13   : > { %p1945_p9 = pneg %p2369_p8  ;;  %s2140_s4 = scalar_lea.hbm %s2577_s1, 9216 }
  0x14   : > { %p2141_p12 = scmp.ne.s32.totalorder %s2577_s1, %s2140_s4  ;;  %p2147_p5 = scmp.lt.u32.totalorder %s2140_s4, %s2577_s1 }
  0x15   : > { %p2378_p11 = pnand %p1945_p9, %p2349_p1 }
  0x17   : > { %p2142_p13 = pneg %p2378_p11 }
  0x19   : > { %p2143_p0 = pnand %p2142_p13, %p2141_p12 }
  0x1b   : > { %p2144_p3 = pneg %p2143_p0 }
  0x1d   : > { %p2149_p7 = pnand %p2147_p5, %p2144_p3 }
  0x1f   : > { %2152 = shalt.err (!%p2149_p7)
}
  0x20   : > { %s2153_s9 = scalar_lea.vmem %s158_s26, 9216  ;;  %p2161_p1 = scmp.lt.s32.totalorder %s158_s26, %s158_s26 }
  0x21   : > { %p2154_p9 = scmp.ne.s32.totalorder %s158_s26, %s2153_s9  ;;  %p2162_p4 = scmp.lt.s32.totalorder %s2153_s9, %s2153_s9 }
  0x23   : > { %p2156_p10 = pnand %p2154_p9, %p2142_p13  ;;  %p2163_p8 = por %p2162_p4, %p2161_p1 }
  0x25   : > { %p2157_p6 = pneg %p2156_p10 }
  0x27   : > { %p2164_p2 = pnand %p2163_p8, %p2157_p6 }
  0x29   : > { %2167 = shalt.err (!%p2164_p2)
}
  0x2a   : > { %s2287_s10 = smov 64   ;;  %s2288_s11 = smov 4  }
  0x2b   : > { %1948 = dma.hbm_to_vmem [thread:$0]  (!%p2378_p11), %s2577_s1, 9216, %s158_s26, [#allocation6], %s2287_s10, %s2287_s10, %s2288_s11  }
  0x2c   : > { %p30_p1 = scmp.ge.s32.totalorder %s29_s28, 2  ;;  %s39_s25 = sadd.s32 1, %s2272_s14 }
  0x2d   : > { %p46_p2 = scmp.ne.s32.totalorder %s2272_s14, %s2268_s13  ;;  %p47_p4 = scmp.eq.s32.totalorder %s2284_s17, 0 }
  0x2e   : > { %s2604_s28 = smov (%p30_p1, %s29_s28), 0  ;;  %p2590_p8 = scmp.ne.s32.totalorder %s2585_s21, 0 }
  0x2f   : > { %p48_p6 = por %p47_p4, %p46_p2  ;;  %s36_s30 = ssub.s32 %s2280_s16, %s2604_s28 }
  0x30   : > { %p2407_p10 = por %p2590_p8, %p46_p2  ;;  %p1958_p12 = scmp.lt.s32.totalorder %s2284_s17, 2 }
  0x31   : > { %p37_p13 = scmp.eq.s32.totalorder %s36_s30, 0  ;;  %s177_s27 = sand.u32 1, %s2272_s14  }
  0x32   : > { %s1934_s4 = smul.u32 288, %s177_s27  ;;  %p2419_p11 = pnand %p1958_p12, %p48_p6 }
  0x33   : > { %s2416_s5 = scalar_select %p37_p13, %s2272_s14, %s39_s25  }
  0x34   : > { %s1935_s26 = smul.u32 4608, %s2280_s16  ;;  %s181_s6 = scalar_lea.vmem [#allocation2], %s1934_s4 }
  0x35   : > { %s188_s7 = sshll.u32 %s181_s6, 4  ;;  %s2430_s11 = scalar_lea.sflag [#allocation3], %s177_s27  ;;  %s2428_s7 = int_to_ptr.vmem [resolvable:$true] %s188_s7 }
  0x36   : > { %s2426_s10 = scalar_lea.hbm %s2576_s0, %s1935_s26  ;;  %p2170_p3 = pneg %p2419_p11 }
  0x37   : > { %s2168_s18 = scalar_lea.hbm %s2426_s10, 4608  ;;  %s2173_s30 = scalar_lea.hbm %s2576_s0, 9216 }
  0x38   : > { %p2169_p0 = scmp.ne.s32.totalorder %s2426_s10, %s2168_s18  ;;  %p2174_p9 = scmp.lt.u32.totalorder %s2426_s10, %s2576_s0 }
  0x39   : > { %p2175_p1 = scmp.lt.u32.totalorder %s2173_s30, %s2168_s18  ;;  %p2177_p4 = scmp.lt.u32.totalorder %s2168_s18, %s2426_s10 }
  0x3a   : > { %p2171_p5 = pnand %p2170_p3, %p2169_p0 }
  0x3b   : > { %p2176_p2 = por %p2175_p1, %p2174_p9 }
  0x3c   : > { %p2172_p7 = pneg %p2171_p5 }
  0x3d   : > { %p2178_p6 = por %p2177_p4, %p2176_p2 }
  0x3f   : > { %p2179_p8 = pnand %p2178_p6, %p2172_p7 }
  0x41   : > { %2182 = shalt.err (!%p2179_p8)
}
  0x42   : > { %s2183_s27 = scalar_lea.vmem %s2428_s7, 4608  ;;  %s2289_s6 = smov [#allocation2]  }
  0x43   : > { %p2184_p12 = scmp.ne.s32.totalorder %s2428_s7, %s2183_s27  ;;  %s2188_s9 = sshll.u32 %s2289_s6, 4  ;;  %s2189_s9 = int_to_ptr.vmem [resolvable:$false] %s2188_s9 }
  0x44   : > { %s2190_s21 = scalar_lea.vmem %s2189_s9, 9216  ;;  %p2191_p5 = scmp.lt.s32.totalorder %s2428_s7, %s2189_s9 }
  0x45   : > { %p2186_p13 = pnand %p2184_p12, %p2170_p3  ;;  %p2192_p9 = scmp.lt.s32.totalorder %s2190_s21, %s2183_s27 }
  0x47   : > { %p2187_p0 = pneg %p2186_p13  ;;  %p2193_p1 = por %p2192_p9, %p2191_p5 }
  0x49   : > { %p2194_p2 = pnand %p2193_p1, %p2187_p0 }
  0x4b   : > { %2197 = shalt.err (!%p2194_p2)
}
  0x4c   : > { %s2290_s18 = smov 576   ;;  %s2291_s19 = smov 36  }
  0x4d   : > { %1952 = dma.hbm_to_vmem [thread:$0]  (!%p2419_p11), %s2426_s10, 4608, %s2428_s7, %s2430_s11, %s2290_s18, %s2290_s18, %s2291_s19  }
  0x4e   : > { %p2593_p3 = scmp.ne.s32.totalorder %s2588_s24, 0 }
  0x4f   : > { %s2461_s25 = sand.u32 (!%p2593_p3), 1, %s2268_s13   ;;  %p2594_p7 = scmp.ne.s32.totalorder (!%p2593_p3), %s2586_s22, 0 }
  0x50   : > { %200 = sbr.rel (%p2593_p3) target bundleno = 430 (0x1ae), region = 32  ;;  %s203_s4 = scalar_lea.sflag (!%p2593_p3), [#allocation3], %s2461_s25 }
  0x51   : > { %s1936_s30 = smul.u32 (!%p2593_p3), 288, %s2461_s25 }
  0x53   : > { %s2465_s26 = scalar_lea.vmem (!%p2593_p3), [#allocation2], %s1936_s30 }
  0x57   : > { %2251 = dma.done.wait (%p2594_p7), %s203_s4, 4608  }
  0x58   : > { %2253 = vsyncadd (%p2594_p7), %s203_s4, 4294962688  ;;  %p2595_p11 = scmp.ne.s32.totalorder %s2584_s20, 0 }
  0x5a   : > { %2255 = dma.done.wait (%p2595_p11), [#allocation6], 9216  }
  0x5b   : > { %2257 = vsyncadd (%p2595_p11), [#allocation6], 4294958080  ;;  %v2016_v0 = vld [vmem:[#allocation5 + $0x40] sm:$0xff]   ;;  %v2020_v4 = vld [vmem:[#allocation5 + $0x48] sm:$0xff]   ;;  %s1567_s24 = sshll.u32 %s2461_s25, 5  ;;  %s1698_s10 = sshll.u32 %s2276_s15, 9 }
  0x5c   : > { %v2017_v1 = vld [vmem:[#allocation5 + $0xc0] sm:$0xff]   ;;  %1722 = vmatprep.subr.bf16.mxu0 %v2016_v0  ;;  %v2021_v5 = vld [vmem:[#allocation5 + $0xc8] sm:$0xff]   ;;  %v2024_v8 = vld [vmem:[#allocation5 + $0x50] sm:$0xff]   ;;  %s235_s7 = scalar_lea.vmem [#allocation7], %s1567_s24  ;;  %s2527_s27 = scalar_lea.hbm %s2579_s3, %s1698_s10 }
  0x5d   : > { %v2018_v2 = vld [vmem:[#allocation5] sm:$0xff]   ;;  %1762 = vmatprep.subr.bf16.mxu1 %v2017_v1  ;;  %v2022_v6 = vld [vmem:[#allocation5 + $0x8] sm:$0xff]   ;;  %v2025_v9 = vld [vmem:[#allocation5 + $0xd0] sm:$0xff]   ;;  %s1451_s8 = sshll.u32 %s235_s7, 4  ;;  %s1437_s6 = scalar_lea.sflag [#allocation4], %s2461_s25  ;;  %s2521_s8 = int_to_ptr.vmem [resolvable:$true] %s1451_s8 }
  0x5e   : > { %v2019_v3 = vld [vmem:[#allocation5 + $0x80] sm:$0xff]   ;;  %1723 = vmatpush3.bf16.msra.mxu0 %v2018_v2  ;;  %v2023_v7 = vld [vmem:[#allocation5 + $0x88] sm:$0xff]   ;;  %v2026_v10 = vld [vmem:[#allocation5 + $0x10] sm:$0xff]   ;;  %s2198_s9 = scalar_lea.vmem %s2521_s8, 512  ;;  %s2292_s21 = smov [#allocation7]  }
  0x5f   : > { %1763 = vmatpush3.bf16.msra.mxu1 %v2019_v3  ;;  %1724 = vmatprep.subr.bf16.mxu0 %v2020_v4  ;;  %v2027_v11 = vld [vmem:[#allocation5 + $0x90] sm:$0xff]   ;;  %v2028_v12 = vld [vmem:[#allocation5 + $0x58] sm:$0xff]   ;;  %v2032_v16 = vld [vmem:[#allocation5 + $0x60] sm:$0xff]   ;;  %p2199_p4 = scmp.ne.s32.totalorder %s2521_s8, %s2198_s9  ;;  %s2202_s18 = sshll.u32 %s2292_s21, 4  ;;  %s2203_s18 = int_to_ptr.vmem [resolvable:$false] %s2202_s18 }
  0x60   : > { %1764 = vmatprep.subr.bf16.mxu1 %v2021_v5  ;;  %v2029_v13 = vld [vmem:[#allocation5 + $0xd8] sm:$0xff]   ;;  %v2033_v17 = vld [vmem:[#allocation5 + $0xe0] sm:$0xff]   ;;  %v2036_v20 = vld [vmem:[#allocation5 + $0x68] sm:$0xff]   ;;  %s2204_s19 = scalar_lea.vmem %s2203_s18, 1024  ;;  %p2205_p12 = scmp.lt.s32.totalorder %s2521_s8, %s2203_s18 }
  0x61   : > { %v2030_v14 = vld [vmem:[#allocation5 + $0x18] sm:$0xff]   ;;  %v2034_v18 = vld [vmem:[#allocation5 + $0x20] sm:$0xff]   ;;  %v2037_v21 = vld [vmem:[#allocation5 + $0xe8] sm:$0xff]   ;;  %p2200_p6 = pnand %p2199_p4, %p2407_p10  ;;  %p2206_p13 = scmp.lt.s32.totalorder %s2204_s19, %s2198_s9 }
  0x62   : > { %1725 = vmatpush3.bf16.msra.mxu0 %v2022_v6  ;;  %v2031_v15 = vld [vmem:[#allocation5 + $0x98] sm:$0xff]   ;;  %v2035_v19 = vld [vmem:[#allocation5 + $0xa0] sm:$0xff]   ;;  %v2038_v22 = vld [vmem:[#allocation5 + $0x28] sm:$0xff]  }
  0x63   : > { %1765 = vmatpush3.bf16.msra.mxu1 %v2023_v7  ;;  %1726 = vmatprep.subr.bf16.mxu0 %v2024_v8  ;;  %v2039_v23 = vld [vmem:[#allocation5 + $0xa8] sm:$0xff]   ;;  %v2040_v24 = vld [vmem:[#allocation5 + $0x70] sm:$0xff]   ;;  %v2044_v28 = vld [vmem:[#allocation5 + $0x78] sm:$0xff]   ;;  %p2201_p8 = pneg %p2200_p6  ;;  %p2207_p0 = por %p2206_p13, %p2205_p12 }
  0x64   : > { %1766 = vmatprep.subr.bf16.mxu1 %v2025_v9  ;;  %v2041_v25 = vld [vmem:[#allocation5 + $0xf0] sm:$0xff]   ;;  %v2045_v29 = vld [vmem:[#allocation5 + $0xf8] sm:$0xff]   ;;  %v2048_v32 = vld [vmem:[%s2465_s26] ss:$36 sps:$4 sm:$0xff]  }
  0x65   : > { %v2042_v26 = vld [vmem:[#allocation5 + $0x30] sm:$0xff]   ;;  %v2046_v30 = vld [vmem:[#allocation5 + $0x38] sm:$0xff]   ;;  %v2050_v33 = vld [vmem:[%s2465_s26 + $0x4] ss:$36 sps:$4 sm:$0xff]   ;;  %p2208_p5 = pnand %p2207_p0, %p2201_p8 }
  0x66   : > { %1727 = vmatpush3.bf16.msra.mxu0 %v2026_v10  ;;  %v2043_v27 = vld [vmem:[#allocation5 + $0xb0] sm:$0xff]   ;;  %v2047_v31 = vld [vmem:[#allocation5 + $0xb8] sm:$0xff]   ;;  %v2051_v34 = vld [vmem:[%s2465_s26 + $0x8] ss:$36 sps:$4 sm:$0xff]   ;;  %1079 = vmatprep.mubr.bf16.mxu0 %v2050_v33 }
  0x67   : > { %1767 = vmatpush3.bf16.msra.mxu1 %v2027_v11  ;;  %1728 = vmatprep.subr.bf16.mxu0 %v2028_v12  ;;  %v2053_v35 = vld [vmem:[%s2465_s26 + $0xc] ss:$36 sps:$4 sm:$0xff]   ;;  %v2054_v36 = vld [vmem:[#allocation5 + $0x140] sm:$0xff]   ;;  %v2064_v45 = vld [vmem:[%s2465_s26 + $0x54] ss:$36 sps:$4 sm:$0xff]  }
  0x68   : > { %1768 = vmatprep.subr.bf16.mxu1 %v2029_v13  ;;  %1144 = vmatprep.mubr.bf16.mxu1 %v2053_v35  ;;  %v2055_v37 = vld [vmem:[#allocation5 + $0x1c0] sm:$0xff]   ;;  %v2058_v40 = vld [vmem:[#allocation5 + $0x148] sm:$0xff]   ;;  %v2067_v47 = vld [vmem:[%s2465_s26 + $0x50] ss:$36 sps:$4 sm:$0xff]  }
  0x69   : > { %v2056_v38 = vld [vmem:[#allocation5 + $0x100] sm:$0xff]   ;;  %v2059_v41 = vld [vmem:[#allocation5 + $0x1c8] sm:$0xff]   ;;  %v2068_v48 = vld [vmem:[#allocation5 + $0x150] sm:$0xff]  }
  0x6a   : > { %1729 = vmatpush3.bf16.msra.mxu0 %v2030_v14  ;;  %v2057_v39 = vld [vmem:[#allocation5 + $0x180] sm:$0xff]   ;;  %v2060_v42 = vld [vmem:[#allocation5 + $0x108] sm:$0xff]   ;;  %v2069_v49 = vld [vmem:[#allocation5 + $0x1d0] sm:$0xff]  }
  0x6b   : > { %1769 = vmatpush3.bf16.msra.mxu1 %v2031_v15  ;;  %1730 = vmatprep.subr.bf16.mxu0 %v2032_v16  ;;  %v2061_v43 = vld [vmem:[#allocation5 + $0x188] sm:$0xff]   ;;  %v2070_v50 = vld [vmem:[#allocation5 + $0x110] sm:$0xff]   ;;  %v2072_v52 = vld [vmem:[#allocation5 + $0x158] sm:$0xff]  }
  0x6c   : > { %1770 = vmatprep.subr.bf16.mxu1 %v2033_v17  ;;  %v2062_v44 = vld [vmem:[%s2465_s26 + $0x4c] ss:$36 sps:$4 sm:$0xff]   ;;  %v2073_v53 = vld [vmem:[#allocation5 + $0x1d8] sm:$0xff]   ;;  %v2082_v60 = vld [vmem:[#allocation5 + $0x160] sm:$0xff]  }
  0x6d   : > { %v2066_v46 = vld [vmem:[%s2465_s26 + $0x48] ss:$36 sps:$4 sm:$0xff]   ;;  %v2071_v51 = vld [vmem:[#allocation5 + $0x190] sm:$0xff]   ;;  %v2074_v54 = vld [vmem:[#allocation5 + $0x118] sm:$0xff]  }
  0x6e   : > { %1731 = vmatpush3.bf16.msra.mxu0 %v2034_v18  ;;  %v2075_v55 = vld [vmem:[#allocation5 + $0x198] sm:$0xff]   ;;  %v2080_v58 = vld [vmem:[%s2465_s26 + $0x90] ss:$36 sps:$4 sm:$0xff]   ;;  %v2083_v61 = vld [vmem:[#allocation5 + $0x1e0] sm:$0xff]  }
  0x6f   : > { %1771 = vmatpush3.bf16.msra.mxu1 %v2035_v19  ;;  %1732 = vmatprep.subr.bf16.mxu0 %v2036_v20  ;;  %v2076_v56 = vld [vmem:[%s2465_s26 + $0x94] ss:$36 sps:$4 sm:$0xff]   ;;  %v2078_v57 = vld [vmem:[%s2465_s26 + $0x9c] ss:$36 sps:$4 sm:$0xff]   ;;  %v2086_v0 = vld [vmem:[#allocation5 + $0x168] sm:$0xff]  }
  0x70   : > { %1772 = vmatprep.subr.bf16.mxu1 %v2037_v21  ;;  %v2081_v59 = vld [vmem:[%s2465_s26 + $0x98] ss:$36 sps:$4 sm:$0xff]   ;;  %v2084_v62 = vld [vmem:[#allocation5 + $0x120] sm:$0xff]   ;;  %v2087_v1 = vld [vmem:[#allocation5 + $0x1e8] sm:$0xff]  }
  0x71   : > { %v2085_v63 = vld [vmem:[#allocation5 + $0x1a0] sm:$0xff]   ;;  %v2088_v2 = vld [vmem:[#allocation5 + $0x128] sm:$0xff]   ;;  %v2094_v6 = vld [vmem:[%s2465_s26 + $0xd8] ss:$36 sps:$4 sm:$0xff]  }
  0x72   : > { %1733 = vmatpush3.bf16.msra.mxu0 %v2038_v22  ;;  %v2089_v3 = vld [vmem:[#allocation5 + $0x1a8] sm:$0xff]   ;;  %v2090_v4 = vld [vmem:[%s2465_s26 + $0xdc] ss:$36 sps:$4 sm:$0xff]   ;;  %v2096_v8 = vld [vmem:[#allocation5 + $0x170] sm:$0xff]  }
  0x73   : > { %1773 = vmatpush3.bf16.msra.mxu1 %v2039_v23  ;;  %1734 = vmatprep.subr.bf16.mxu0 %v2040_v24  ;;  %v2092_v5 = vld [vmem:[%s2465_s26 + $0xe4] ss:$36 sps:$4 sm:$0xff]   ;;  %v2097_v9 = vld [vmem:[#allocation5 + $0x1f0] sm:$0xff]   ;;  %v2100_v12 = vld [vmem:[#allocation5 + $0x178] sm:$0xff]  }
  0x74   : > { %1774 = vmatprep.subr.bf16.mxu1 %v2041_v25  ;;  %v2095_v7 = vld [vmem:[%s2465_s26 + $0xe0] ss:$36 sps:$4 sm:$0xff]   ;;  %v2098_v10 = vld [vmem:[#allocation5 + $0x130] sm:$0xff]   ;;  %v2101_v13 = vld [vmem:[#allocation5 + $0x1f8] sm:$0xff]  }
  0x75   : > { %v2099_v11 = vld [vmem:[#allocation5 + $0x1b0] sm:$0xff]   ;;  %v2102_v14 = vld [vmem:[#allocation5 + $0x138] sm:$0xff]   ;;  %v2110_v20 = vld [vmem:[#allocation5 + $0x200] sm:$0xff]  }
  0x76   : > { %1735 = vmatpush3.bf16.msra.mxu0 %v2042_v26  ;;  %v2103_v15 = vld [vmem:[#allocation5 + $0x1b8] sm:$0xff]   ;;  %v2104_v16 = vld [vmem:[%s2465_s26 + $0x10] ss:$36 sps:$4 sm:$0xff]   ;;  %v2111_v21 = vld [vmem:[#allocation5 + $0x208] sm:$0xff]  }
  0x77   : > { %1775 = vmatpush3.bf16.msra.mxu1 %v2043_v27  ;;  %1736 = vmatprep.subr.bf16.mxu0 %v2044_v28  ;;  %v2106_v17 = vld [vmem:[%s2465_s26 + $0x14] ss:$36 sps:$4 sm:$0xff]   ;;  %v2109_v19 = vld [vmem:[%s2465_s26 + $0x1c] ss:$36 sps:$4 sm:$0xff]   ;;  %v2114_v23 = vld [vmem:[%s2465_s26 + $0x64] ss:$36 sps:$4 sm:$0xff]  }
  0x78   : > { %1776 = vmatprep.subr.bf16.mxu1 %v2045_v29  ;;  %v2107_v18 = vld [vmem:[%s2465_s26 + $0x18] ss:$36 sps:$4 sm:$0xff]   ;;  %v2117_v25 = vld [vmem:[%s2465_s26 + $0x60] ss:$36 sps:$4 sm:$0xff]   ;;  %v2118_v26 = vld [vmem:[#allocation5 + $0x210] sm:$0xff]  }
  0x79   : > { %v2112_v22 = vld [vmem:[%s2465_s26 + $0x5c] ss:$36 sps:$4 sm:$0xff]   ;;  %v2120_v27 = vld [vmem:[%s2465_s26 + $0xa4] ss:$36 sps:$4 sm:$0xff]   ;;  %v2122_v28 = vld [vmem:[%s2465_s26 + $0xac] ss:$36 sps:$4 sm:$0xff]  }
  0x7a   : > { %1737 = vmatpush3.bf16.msra.mxu0 %v2046_v30  ;;  %v2116_v24 = vld [vmem:[%s2465_s26 + $0x58] ss:$36 sps:$4 sm:$0xff]   ;;  %v2124_v30 = vld [vmem:[%s2465_s26 + $0xa0] ss:$36 sps:$4 sm:$0xff]   ;;  %v2128_v33 = vld [vmem:[%s2465_s26 + $0xec] ss:$36 sps:$4 sm:$0xff]  }
  0x7b   : > { %1777 = vmatpush3.bf16.msra.mxu1 %v2047_v31  ;;  %1802 = vmatprep.subr.bf16.mxu0 %v2054_v36  ;;  %v2119_v29 = vld [vmem:[#allocation5 + $0x218] sm:$0xff]   ;;  %v2125_v31 = vld [vmem:[%s2465_s26 + $0xa8] ss:$36 sps:$4 sm:$0xff]  }
  0x7c   : > { %1842 = vmatprep.subr.bf16.mxu1 %v2055_v37  ;;  %v2127_v35 = vld [vmem:[#allocation5 + $0x228] sm:$0xff]   ;;  %v2134_v37 = vld [vmem:[#allocation5 + $0x230] sm:$0xff]  }
  0x7d   : > { %1080 = vmatmul.mubr.bf16.vlgmr.msra.gmra.mrb[0].mxu0 %v2048_v32  ;;  %v2126_v32 = vld [vmem:[#allocation5 + $0x220] sm:$0xff]   ;;  %v2132_v36 = vld [vmem:[%s2465_s26 + $0xe8] ss:$36 sps:$4 sm:$0xff]  }
  0x7e   : > { %1145 = vmatmul.mubr.bf16.vlgmr.msra.gmra.mrb[0].mxu1 %v2051_v34  ;;  %1803 = vmatpush3.bf16.msra.mxu0 %v2056_v38  ;;  %v2130_v34 = vld [vmem:[%s2465_s26 + $0xf4] ss:$36 sps:$4 sm:$0xff]  }
  0x7f   : > { %1843 = vmatpush3.bf16.msra.mxu1 %v2057_v39  ;;  %1804 = vmatprep.subr.bf16.mxu0 %v2058_v40  ;;  %v2133_v38 = vld [vmem:[%s2465_s26 + $0xf0] ss:$36 sps:$4 sm:$0xff]   ;;  %v2136_v39 = vld [vmem:[%s2465_s26 + $0x20] ss:$36 sps:$4 sm:$0xff]  }
  0x80   : > { %1844 = vmatprep.subr.bf16.mxu1 %v2059_v41  ;;  %1087 = vmatprep.mubr.bf16.mxu0 %v2062_v44  ;;  %v2137_v40 = vld [vmem:[%s2465_s26 + $0xb0] ss:$36 sps:$4 sm:$0xff]   ;;  %v2135_v41 = vld [vmem:[#allocation5 + $0x238] sm:$0xff]  }
  0x81   : > { %1152 = vmatprep.mubr.bf16.mxu1 %v2064_v45 }
  0x82   : > { %1805 = vmatpush3.bf16.msra.mxu0 %v2060_v42  ;;  %v2138_v42 = vld [vmem:[%s2465_s26 + $0x68] ss:$36 sps:$4 sm:$0xff]  }
  0x83   : > { %1845 = vmatpush3.bf16.msra.mxu1 %v2061_v43  ;;  %1806 = vmatprep.subr.bf16.mxu0 %v2068_v48  ;;  %v2139_v43 = vld [vmem:[%s2465_s26 + $0xf8] ss:$36 sps:$4 sm:$0xff]  }
  0x84   : > { %1846 = vmatprep.subr.bf16.mxu1 %v2069_v49 }
  0x85   : > { %1088 = vmatmul.mubr.bf16.gmra.mrb[4].mxu0 %v2066_v46  ;;  %v1568_v46 = vld [vmem:[%s2578_s2] ss:$0 sm:$0xff] }
  0x86   : > { %1153 = vmatmul.mubr.bf16.gmra.mrb[4].mxu1 %v2067_v47  ;;  %1807 = vmatpush3.bf16.msra.mxu0 %v2070_v50 }
  0x87   : > { %1847 = vmatpush3.bf16.msra.mxu1 %v2071_v51  ;;  %1808 = vmatprep.subr.bf16.mxu0 %v2072_v52 }
  0x88   : > { %1848 = vmatprep.subr.bf16.mxu1 %v2073_v53  ;;  %1095 = vmatprep.mubr.bf16.mxu0 %v2076_v56 }
  0x89   : > { %1160 = vmatprep.mubr.bf16.mxu1 %v2078_v57 }
  0x8a   : > { %1809 = vmatpush3.bf16.msra.mxu0 %v2074_v54 }
  0x8b   : > { %1849 = vmatpush3.bf16.msra.mxu1 %v2075_v55  ;;  %1810 = vmatprep.subr.bf16.mxu0 %v2082_v60 }
  0x8c   : > { %1850 = vmatprep.subr.bf16.mxu1 %v2083_v61 }
  0x8d   : > { %1096 = vmatmul.mubr.bf16.gmra.mrb[8].mxu0 %v2080_v58 }
  0x8e   : > { %1161 = vmatmul.mubr.bf16.gmra.mrb[8].mxu1 %v2081_v59  ;;  %1811 = vmatpush3.bf16.msra.mxu0 %v2084_v62 }
  0x8f   : > { %1851 = vmatpush3.bf16.msra.mxu1 %v2085_v63  ;;  %1812 = vmatprep.subr.bf16.mxu0 %v2086_v0 }
  0x90   : > { %1852 = vmatprep.subr.bf16.mxu1 %v2087_v1  ;;  %1103 = vmatprep.mubr.bf16.mxu0 %v2090_v4 }
  0x91   : > { %1168 = vmatprep.mubr.bf16.mxu1 %v2092_v5 }
  0x92   : > { %1813 = vmatpush3.bf16.msra.mxu0 %v2088_v2 }
  0x93   : > { %1853 = vmatpush3.bf16.msra.mxu1 %v2089_v3  ;;  %1814 = vmatprep.subr.bf16.mxu0 %v2096_v8 }
  0x94   : > { %1854 = vmatprep.subr.bf16.mxu1 %v2097_v9 }
  0x95   : > { %1104 = vmatmul.mubr.bf16.gmra.mrb[12].mxu0 %v2094_v6 }
  0x96   : > { %1169 = vmatmul.mubr.bf16.gmra.mrb[12].mxu1 %v2095_v7  ;;  %1815 = vmatpush3.bf16.msra.mxu0 %v2098_v10 }
  0x97   : > { %1855 = vmatpush3.bf16.msra.mxu1 %v2099_v11  ;;  %1816 = vmatprep.subr.bf16.mxu0 %v2100_v12 }
  0x98   : > { %1856 = vmatprep.subr.bf16.mxu1 %v2101_v13  ;;  %1209 = vmatprep.mubr.bf16.mxu0 %v2106_v17 }
  0x99   : > { %1274 = vmatprep.mubr.bf16.mxu1 %v2109_v19 }
  0x9a   : > { %1817 = vmatpush3.bf16.msra.mxu0 %v2102_v14 }
  0x9b   : > { %1857 = vmatpush3.bf16.msra.mxu1 %v2103_v15  ;;  %1894 = vmatprep.subr.bf16.mxu0 %v2110_v20 }
  0x9c   : > { %1918 = vmatprep.subr.bf16.mxu1 %v2110_v20 }
  0x9d   : > { %1210 = vmatmul.mubr.bf16.vlgmr.msra.gmra.mrb[16].mxu0 %v2104_v16 }
  0x9e   : > { %1275 = vmatmul.mubr.bf16.vlgmr.msra.gmra.mrb[16].mxu1 %v2107_v18  ;;  %1895 = vmatpush3.bf16.msra.mxu0 %v2110_v20 }
  0x9f   : > { %1926 = vmatpush3.bf16.msra.mxu1 %v2110_v20  ;;  %1896 = vmatprep.subr.bf16.mxu0 %v2111_v21 }
  0xa0   : > { %1919 = vmatprep.subr.bf16.mxu1 %v2111_v21  ;;  %1217 = vmatprep.mubr.bf16.mxu0 %v2112_v22 }
  0xa1   : > { %1282 = vmatprep.mubr.bf16.mxu1 %v2114_v23 }
  0xa2   : > { %1897 = vmatpush3.bf16.msra.mxu0 %v2111_v21 }
  0xa3   : > { %1927 = vmatpush3.bf16.msra.mxu1 %v2111_v21  ;;  %1898 = vmatprep.subr.bf16.mxu0 %v2118_v26 }
  0xa4   : > { %1920 = vmatprep.subr.bf16.mxu1 %v2118_v26 }
  0xa5   : > { %1218 = vmatmul.mubr.bf16.gmra.mrb[20].mxu0 %v2116_v24 }
  0xa6   : > { %1283 = vmatmul.mubr.bf16.gmra.mrb[20].mxu1 %v2117_v25  ;;  %1225 = vmatprep.mubr.bf16.mxu0 %v2120_v27 }
  0xa7   : > { %1899 = vmatpush3.bf16.msra.mxu0 %v2118_v26  ;;  %1290 = vmatprep.mubr.bf16.mxu1 %v2122_v28 }
  0xa8   : > { %1928 = vmatpush3.bf16.msra.mxu1 %v2118_v26  ;;  %1900 = vmatprep.subr.bf16.mxu0 %v2119_v29 }
  0xa9   : > { %1921 = vmatprep.subr.bf16.mxu1 %v2119_v29 }
  0xab   : > { %1901 = vmatpush3.bf16.msra.mxu0 %v2119_v29 }
  0xac   : > { %1929 = vmatpush3.bf16.msra.mxu1 %v2119_v29  ;;  %1902 = vmatprep.subr.bf16.mxu0 %v2126_v32 }
  0xad   : > { %1226 = vmatmul.mubr.bf16.gmra.mrb[24].mxu0 %v2124_v30  ;;  %1922 = vmatprep.subr.bf16.mxu1 %v2126_v32 }
  0xae   : > { %1291 = vmatmul.mubr.bf16.gmra.mrb[24].mxu1 %v2125_v31  ;;  %1233 = vmatprep.mubr.bf16.mxu0 %v2128_v33 }
  0xaf   : > { %1903 = vmatpush3.bf16.msra.mxu0 %v2126_v32  ;;  %1298 = vmatprep.mubr.bf16.mxu1 %v2130_v34 }
  0xb0   : > { %1930 = vmatpush3.bf16.msra.mxu1 %v2126_v32  ;;  %1904 = vmatprep.subr.bf16.mxu0 %v2127_v35 }
  0xb1   : > { %1923 = vmatprep.subr.bf16.mxu1 %v2127_v35 }
  0xb3   : > { %1905 = vmatpush3.bf16.msra.mxu0 %v2127_v35 }
  0xb4   : > { %1931 = vmatpush3.bf16.msra.mxu1 %v2127_v35  ;;  %1906 = vmatprep.subr.bf16.mxu0 %v2134_v37 }
  0xb5   : > { %1234 = vmatmul.mubr.bf16.gmra.mrb[28].mxu0 %v2132_v36  ;;  %1924 = vmatprep.subr.bf16.mxu1 %v2134_v37 }
  0xb6   : > { %1299 = vmatmul.mubr.bf16.gmra.mrb[28].mxu1 %v2133_v38  ;;  %1910 = vmatprep.mubr.bf16.mxu0 %v2136_v39 }
  0xb7   : > { %1907 = vmatpush3.bf16.msra.mxu0 %v2134_v37  ;;  %1914 = vmatprep.mubr.bf16.mxu1 %v2137_v40 }
  0xb8   : > { %1932 = vmatpush3.bf16.msra.mxu1 %v2134_v37  ;;  %1908 = vmatprep.subr.bf16.mxu0 %v2135_v41 }
  0xb9   : > { %1925 = vmatprep.subr.bf16.mxu1 %v2135_v41 }
  0xbb   : > { %1909 = vmatpush3.bf16.msra.mxu0 %v2135_v41 }
  0xbc   : > { %1933 = vmatpush3.bf16.msra.mxu1 %v2135_v41 }
  0xbe   : > { %1911 = vmatmul.mubr.bf16.vlgmr.msra.gmra.mrb[32].mxu0 %v2138_v42 }
  0xbf   : > { %1915 = vmatmul.mubr.bf16.vlgmr.msra.gmra.mrb[32].mxu1 %v2139_v43 }
 0x150   : > { %v1738_v44 = vpop.f32.mrb[0].mxu0 }
 0x151   : > { %v1778_v45 = vpop.f32.mrb[0].mxu1  ;;  %v1739_v47 = vpop.f32.mrb[1].mxu0 }
 0x152   : > { %v1740_v48 = vadd.f32 %v1739_v47, %v1738_v44  ;;  %v1779_v49 = vpop.f32.mrb[1].mxu1  ;;  %v1741_v50 = vpop.f32.mrb[2].mxu0 }
 0x153   : > { %v1780_v51 = vadd.f32 %v1779_v49, %v1778_v45  ;;  %v1781_v52 = vpop.f32.mrb[2].mxu1  ;;  %v1742_v53 = vpop.f32.mrb[3].mxu0 }
 0x154   : > { %v1082_v54 = vadd.f32 %v1740_v48, %v1568_v46  ;;  %v1743_v55 = vadd.f32 %v1742_v53, %v1741_v50  ;;  %v1782_v56 = vpop.f32.mrb[3].mxu1 }
 0x155   : > { %v1783_v57 = vadd.f32 %v1782_v56, %v1781_v52 }
 0x156   : > { %v1147_v58 = vadd.f32 %v1780_v51, %v1082_v54  ;;  %v1085_v59 = vadd.f32 %v1743_v55, %v1568_v46 }
 0x158   : > { %v1150_v60 = vadd.f32 %v1783_v57, %v1085_v59  ;;  %v1744_v61 = vpop.f32.mrb[4].mxu0 }
 0x159   : > { %v1784_v62 = vpop.f32.mrb[4].mxu1  ;;  %v1745_v63 = vpop.f32.mrb[5].mxu0 }
 0x15a   : > { %v1746_v0 = vadd.f32 %v1745_v63, %v1744_v61  ;;  %v1785_v1 = vpop.f32.mrb[5].mxu1  ;;  %v1747_v2 = vpop.f32.mrb[6].mxu0 }
 0x15b   : > { %v1786_v3 = vadd.f32 %v1785_v1, %v1784_v62  ;;  %v1787_v4 = vpop.f32.mrb[6].mxu1  ;;  %v1748_v5 = vpop.f32.mrb[7].mxu0 }
 0x15c   : > { %v1090_v6 = vadd.f32 %v1746_v0, %v1568_v46  ;;  %v1749_v7 = vadd.f32 %v1748_v5, %v1747_v2  ;;  %v1788_v8 = vpop.f32.mrb[7].mxu1 }
 0x15d   : > { %v1789_v9 = vadd.f32 %v1788_v8, %v1787_v4 }
 0x15e   : > { %v1155_v10 = vadd.f32 %v1786_v3, %v1090_v6  ;;  %v1093_v11 = vadd.f32 %v1749_v7, %v1568_v46 }
 0x160   : > { %v1158_v12 = vadd.f32 %v1789_v9, %v1093_v11  ;;  %v1750_v13 = vpop.f32.mrb[8].mxu0 }
 0x161   : > { %v1790_v14 = vpop.f32.mrb[8].mxu1  ;;  %v1751_v15 = vpop.f32.mrb[9].mxu0 }
 0x162   : > { %v1752_v16 = vadd.f32 %v1751_v15, %v1750_v13  ;;  %v1791_v17 = vpop.f32.mrb[9].mxu1  ;;  %v1753_v18 = vpop.f32.mrb[10].mxu0 }
 0x163   : > { %v1792_v19 = vadd.f32 %v1791_v17, %v1790_v14  ;;  %v1793_v20 = vpop.f32.mrb[10].mxu1  ;;  %v1754_v21 = vpop.f32.mrb[11].mxu0 }
 0x164   : > { %v1098_v22 = vadd.f32 %v1752_v16, %v1568_v46  ;;  %v1755_v23 = vadd.f32 %v1754_v21, %v1753_v18  ;;  %v1794_v24 = vpop.f32.mrb[11].mxu1 }
 0x165   : > { %v1795_v25 = vadd.f32 %v1794_v24, %v1793_v20 }
 0x166   : > { %v1163_v26 = vadd.f32 %v1792_v19, %v1098_v22  ;;  %v1101_v27 = vadd.f32 %v1755_v23, %v1568_v46 }
 0x168   : > { %v1166_v28 = vadd.f32 %v1795_v25, %v1101_v27  ;;  %v1756_v29 = vpop.f32.mrb[12].mxu0 }
 0x169   : > { %v1796_v30 = vpop.f32.mrb[12].mxu1  ;;  %v1757_v31 = vpop.f32.mrb[13].mxu0 }
 0x16a   : > { %v1797_v32 = vpop.f32.mrb[13].mxu1  ;;  %v1758_v33 = vadd.f32 %v1757_v31, %v1756_v29  ;;  %v1759_v35 = vpop.f32.mrb[14].mxu0 }
 0x16b   : > { %v1798_v34 = vadd.f32 %v1797_v32, %v1796_v30  ;;  %v1799_v36 = vpop.f32.mrb[14].mxu1  ;;  %v1760_v37 = vpop.f32.mrb[15].mxu0 }
 0x16c   : > { %v1800_v38 = vpop.f32.mrb[15].mxu1  ;;  %v1106_v39 = vadd.f32 %v1758_v33, %v1568_v46  ;;  %v1761_v40 = vadd.f32 %v1760_v37, %v1759_v35 }
 0x16d   : > { %v1801_v41 = vadd.f32 %v1800_v38, %v1799_v36 }
 0x16e   : > { %v1171_v42 = vadd.f32 %v1798_v34, %v1106_v39  ;;  %v1109_v43 = vadd.f32 %v1761_v40, %v1568_v46 }
 0x170   : > { %v1174_v44 = vadd.f32 %v1801_v41, %v1109_v43  ;;  %v1818_v45 = vpop.f32.mrb[16].mxu0 }
 0x171   : > { %v1819_v47 = vpop.f32.mrb[17].mxu0  ;;  %v1858_v48 = vpop.f32.mrb[16].mxu1 }
 0x172   : > { %v1820_v49 = vadd.f32 %v1819_v47, %v1818_v45  ;;  %v1821_v50 = vpop.f32.mrb[18].mxu0  ;;  %v1859_v51 = vpop.f32.mrb[17].mxu1 }
 0x173   : > { %v1822_v52 = vpop.f32.mrb[19].mxu0  ;;  %v1860_v54 = vadd.f32 %v1859_v51, %v1858_v48  ;;  %v1861_v55 = vpop.f32.mrb[18].mxu1 }
 0x174   : > { %v1212_v53 = vadd.f32 %v1820_v49, %v1147_v58  ;;  %v1823_v56 = vadd.f32 %v1822_v52, %v1821_v50  ;;  %v1862_v57 = vpop.f32.mrb[19].mxu1 }
 0x175   : > { %v1863_v61 = vadd.f32 %v1862_v57, %v1861_v55 }
 0x176   : > { %v1215_v59 = vadd.f32 %v1823_v56, %v1150_v60  ;;  %v1277_v62 = vadd.f32 %v1860_v54, %v1212_v53 }
 0x178   : > { %v1824_v63 = vpop.f32.mrb[20].mxu0  ;;  %v2514_v0 = vadd.f32 %v1863_v61, %v1215_v59 }
 0x179   : > { %v1825_v46 = vpop.f32.mrb[21].mxu0  ;;  %v1864_v1 = vpop.f32.mrb[20].mxu1 }
 0x17a   : > { %v1826_v2 = vadd.f32 %v1825_v46, %v1824_v63  ;;  %v1827_v3 = vpop.f32.mrb[22].mxu0  ;;  %v1865_v4 = vpop.f32.mrb[21].mxu1 }
 0x17b   : > { %v1828_v5 = vpop.f32.mrb[23].mxu0  ;;  %v1866_v7 = vadd.f32 %v1865_v4, %v1864_v1  ;;  %v1867_v8 = vpop.f32.mrb[22].mxu1 }
 0x17c   : > { %v1220_v6 = vadd.f32 %v1826_v2, %v1155_v10  ;;  %v1829_v58 = vadd.f32 %v1828_v5, %v1827_v3  ;;  %v1868_v9 = vpop.f32.mrb[23].mxu1 }
 0x17d   : > { %v1869_v13 = vadd.f32 %v1868_v9, %v1867_v8 }
 0x17e   : > { %v1223_v11 = vadd.f32 %v1829_v58, %v1158_v12  ;;  %v1285_v14 = vadd.f32 %v1866_v7, %v1220_v6 }
 0x180   : > { %v1830_v60 = vpop.f32.mrb[24].mxu0  ;;  %v1288_v15 = vadd.f32 %v1869_v13, %v1223_v11 }
 0x181   : > { %v1831_v16 = vpop.f32.mrb[25].mxu0  ;;  %v1870_v17 = vpop.f32.mrb[24].mxu1 }
 0x182   : > { %v1832_v18 = vadd.f32 %v1831_v16, %v1830_v60  ;;  %v1833_v19 = vpop.f32.mrb[26].mxu0  ;;  %v1871_v20 = vpop.f32.mrb[25].mxu1 }
 0x183   : > { %v1834_v21 = vpop.f32.mrb[27].mxu0  ;;  %v1872_v23 = vadd.f32 %v1871_v20, %v1870_v17  ;;  %v1873_v24 = vpop.f32.mrb[26].mxu1 }
 0x184   : > { %v1228_v22 = vadd.f32 %v1832_v18, %v1163_v26  ;;  %v1835_v25 = vadd.f32 %v1834_v21, %v1833_v19  ;;  %v1874_v10 = vpop.f32.mrb[27].mxu1 }
 0x185   : > { %v1875_v29 = vadd.f32 %v1874_v10, %v1873_v24 }
 0x186   : > { %v1231_v27 = vadd.f32 %v1835_v25, %v1166_v28  ;;  %v1293_v30 = vadd.f32 %v1872_v23, %v1228_v22 }
 0x188   : > { %v1836_v31 = vpop.f32.mrb[28].mxu0  ;;  %v1296_v12 = vadd.f32 %v1875_v29, %v1231_v27 }
 0x189   : > { %v1837_v32 = vpop.f32.mrb[29].mxu0  ;;  %v1876_v33 = vpop.f32.mrb[28].mxu1 }
 0x18a   : > { %v1838_v34 = vadd.f32 %v1837_v32, %v1836_v31  ;;  %v1839_v35 = vpop.f32.mrb[30].mxu0  ;;  %v1877_v36 = vpop.f32.mrb[29].mxu1 }
 0x18b   : > { %v1840_v37 = vpop.f32.mrb[31].mxu0  ;;  %v1878_v39 = vadd.f32 %v1877_v36, %v1876_v33  ;;  %v1879_v40 = vpop.f32.mrb[30].mxu1 }
 0x18c   : > { %v1236_v38 = vadd.f32 %v1838_v34, %v1171_v42  ;;  %v1841_v26 = vadd.f32 %v1840_v37, %v1839_v35  ;;  %v1880_v41 = vpop.f32.mrb[31].mxu1 }
 0x18d   : > { %v1881_v45 = vadd.f32 %v1880_v41, %v1879_v40 }
 0x18e   : > { %v1239_v43 = vadd.f32 %v1841_v26, %v1174_v44  ;;  %v1301_v47 = vadd.f32 %v1878_v39, %v1236_v38 }
 0x190   : > { %v1304_v28 = vadd.f32 %v1881_v45, %v1239_v43 }
 0x191   : > { %v1912_v48 = vpop.f32.mrb[32].mxu0 }
 0x192   : > { %v1350_v49 = vadd.f32 %v1912_v48, %v1285_v14  ;;  %v1916_v50 = vpop.f32.mrb[32].mxu1  ;;  %v1341_v51 = vpop.f32.mrb[33].mxu0 }
 0x193   : > { %v1366_v52 = vadd.f32 %v1916_v50, %v1301_v47  ;;  %v1342_v53 = vadd.f32 %v1341_v51, %v1277_v62  ;;  %v1357_v54 = vpop.f32.mrb[33].mxu1  ;;  %v1913_v55 = vpop.f32.mrb[34].mxu0 }
 0x194   : > { %v1382_v56 = vmul.f32 0.01, %v1350_v49  ;;  %v1358_v42 = vadd.f32 %v1357_v54, %v1293_v30  ;;  %v1353_v57 = vadd.f32 %v1913_v55, %v1288_v15  ;;  %v1917_v59 = vpop.f32.mrb[34].mxu1  ;;  %v1344_v61 = vpop.f32.mrb[35].mxu0  ;;  %vm1374_vm0 = vcmp.ge.f32.partialorder %v1350_v49, 0.0 }
 0x195   : > { %vm1378_vm1 = vcmp.ge.f32.partialorder %v1366_v52, 0.0  ;;  %v1386_v44 = vmul.f32 0.01, %v1366_v52  ;;  %v1360_v63 = vpop.f32.mrb[35].mxu1  ;;  %vm1372_vm3 = vcmp.ge.f32.partialorder %v1342_v53, 0.0  ;;  %v1369_v2 = vadd.f32 %v1917_v59, %v1304_v28 }
 0x196   : > { %vm1375_vm2 = vcmp.ge.f32.partialorder %v1353_v57, 0.0  ;;  %v1380_v46 = vmul.f32 0.01, %v1342_v53  ;;  %v1383_v1 = vmul.f32 0.01, %v1353_v57  ;;  %v1390_v3 = vsel %vm1374_vm0, %v1350_v49, %v1382_v56 }
 0x197   : > { %vm1376_vm4 = vcmp.ge.f32.partialorder %v1358_v42, 0.0  ;;  %v1345_v62 = vadd.f32 %v1344_v61, %v2514_v0  ;;  %v1361_v4 = vadd.f32 %v1360_v63, %v1296_v12  ;;  %v1384_v5 = vmul.f32 0.01, %v1358_v42 }
 0x198   : > { %v1391_v6 = vsel %vm1375_vm2, %v1353_v57, %v1383_v1  ;;  %vm1379_vm5 = vcmp.ge.f32.partialorder %v1369_v2, 0.0  ;;  %v1387_v7 = vmul.f32 0.01, %v1369_v2  ;;  %v1394_v9 = vsel %vm1378_vm1, %v1366_v52, %v1386_v44 }
 0x199   : > { %v1707_v8 = vpack.c.bf16 %v1391_v6, %v1390_v3  ;;  %vm1373_vm6 = vcmp.ge.f32.partialorder %v1345_v62, 0.0  ;;  %v1381_v58 = vmul.f32 0.01, %v1345_v62  ;;  %vm1377_vm7 = vcmp.ge.f32.partialorder %v1361_v4, 0.0 }
 0x19a   : > { %v1395_v11 = vsel %vm1379_vm5, %v1369_v2, %v1387_v7  ;;  %v1385_v13 = vmul.f32 0.01, %v1361_v4  ;;  %v1388_v14 = vsel %vm1372_vm3, %v1342_v53, %v1380_v46  ;;  %v1392_v15 = vsel %vm1376_vm4, %v1358_v42, %v1384_v5 }
 0x19b   : > { %1719 = vst [vmem:[%s235_s7 + $0x8] sm:$0xff] %v1707_v8   ;;  %v1717_v0 = vpack.c.bf16 %v1395_v11, %v1394_v9  ;;  %v1389_v60 = vsel %vm1373_vm6, %v1345_v62, %v1381_v58 }
 0x19c   : > { %v1702_v16 = vpack.c.bf16 %v1389_v60, %v1388_v14  ;;  %v1393_v17 = vsel %vm1377_vm7, %v1361_v4, %v1385_v13 }
 0x19d   : > { %1721 = vst [vmem:[%s235_s7 + $0x18] sm:$0xff] %v1717_v0   ;;  %v1712_v18 = vpack.c.bf16 %v1393_v17, %v1392_v15 }
 0x19e   : > { %1703 = vst [vmem:[%s235_s7] sm:$0xff] %v1702_v16  }
 0x19f   : > { %1720 = vst [vmem:[%s235_s7 + $0x10] sm:$0xff] %v1712_v18  }
 0x1a0   : > { %2211 = shalt.err (!%p2208_p5)
}
 0x1a1   : > { %s2212_s30 = scalar_lea.hbm %s2527_s27, 512  ;;  %s2216_s20 = scalar_lea.hbm %s2579_s3, 1024 }
 0x1a2   : > { %p2213_p9 = scmp.ne.s32.totalorder %s2527_s27, %s2212_s30  ;;  %p2217_p3 = scmp.lt.u32.totalorder %s2527_s27, %s2579_s3 }
 0x1a3   : > { %p2218_p7 = scmp.lt.u32.totalorder %s2216_s20, %s2212_s30  ;;  %p2220_p4 = scmp.lt.u32.totalorder %s2212_s30, %s2527_s27 }
 0x1a4   : > { %p2214_p1 = pnand %p2213_p9, %p2407_p10 }
 0x1a5   : > { %p2219_p11 = por %p2218_p7, %p2217_p3 }
 0x1a6   : > { %p2215_p2 = pneg %p2214_p1 }
 0x1a7   : > { %p2221_p6 = por %p2220_p4, %p2219_p11 }
 0x1a9   : > { %p2222_p8 = pnand %p2221_p6, %p2215_p2 }
 0x1ab   : > { %2225 = shalt.err (!%p2222_p8)
}
 0x1ac   : > { %s2293_s7 = smov 64   ;;  %s2294_s10 = smov 4  }
 0x1ad   : > { %1943 = dma.vmem_to_hbm [thread:$0]  (%p2407_p10), %s2521_s8, 512, %s2527_s27, %s1437_s6, %s2293_s7, %s2293_s7, %s2294_s10  }
 0x1ae PF: > { %s1466_s15 = sand.u32 1, %s2264_s12   ;;  %p2596_p12 = scmp.ne.s32.totalorder %s2587_s23, 0 }
 0x1af   : > { %p2597_p13 = scmp.ge.s32.totalorder %s2284_s17, 2  ;;  %s1467_s11 = scalar_lea.sflag [#allocation4], %s1466_s15 }
 0x1b1   : > { %p1954_p0 = pnand %p2597_p13, %p2596_p12 }
 0x1b3   : > { %2259 = dma.done.wait (!%p1954_p0), %s1467_s11, 512  }
 0x1b4   : > { %2261 = vsyncadd (!%p1954_p0), %s1467_s11, 4294966784  ;;  %s20_s17 = sadd.s32 1, %s2284_s17   ;;  %s2598_s12 = smov %s2268_s13 }
 0x1b5   : > { %p17_p5 = scmp.ge.s32.totalorder %s20_s17, 4   ;;  %s2599_s13 = smov %s2272_s14 }
 0x1b6   : > { %s2600_s14 = smov %s2416_s5  ;;  %s2601_s15 = smov %s2280_s16 }
 0x1b7   : > { %s2602_s16 = smov %s2604_s28  ;;  %19 = sbr.rel (!%p17_p5) target bundleno = 7 (0x7), region = 85 }
 0x1be   :  { %1472 = vsyncpa [#allocation3], 1 }
 0x1bf   :  { %1474 = vsyncpa [#allocation3 + $0x1], 1 }
 0x1c0   :  { %1475 = vsyncpa [#allocation6], 1 }
 0x1c1   :  { %1476 = vsyncpa [#allocation4], 1 }
 0x1c2   :  { %1478 = vsyncpa [#allocation4 + $0x1], 1 }

</bundles_post_ra>
